<compile_context>
chip_gen: v5e
topology: v5e:2x2
jax: 0.10.0
libtpu: 0.0.40
codegen_flags: <defaults>
</compile_context>

<pallas_src>
import functools
import math

import jax
import jax.numpy as jnp
from jax.experimental import pallas as pl
from jax.experimental.pallas import tpu as pltpu


def _portaspeech_loss_kernel(
    mel_p_ref, mel_t_ref, mel_m_ref,          # mel L1 loss inputs
    ldp_ref, dur_ref, swm_ref,                # duration MSE loss inputs (resident)
    zp_ref, lq_ref, klm_ref,                  # KL loss inputs
    z_ref, logdet_ref,                        # MLE (postnet) loss inputs
    out_ref,                                  # SMEM (5,): total, mel, kl, postnet, dur
    acc_ref,                                  # SMEM (6,) scratch partial sums
    *,
    t_tile, t_total, n_mels, d_latent, n_post_elems, partial_last,
):
    t = pl.program_id(0)
    n_t = pl.num_programs(0)

    # -------- init partial-sum accumulators on the first T tile --------
    @pl.when(t == 0)
    def _init():
        for i in range(6):
            acc_ref[i] = jnp.float32(0.0)

    # Validity mask for the (possibly padded) last T tile; skipped entirely
    # (statically) when T divides the tile size.
    if partial_last:
        col = jax.lax.broadcasted_iota(jnp.int32, (1, t_tile), 1)
        valid = ((col + t * t_tile) < t_total).astype(jnp.float32)   # [1, T_TILE]
    else:
        valid = None

    # -------- mel L1: reduce over n_mels (lanes) first, then mask [B, T] --------
    mel_p = mel_p_ref[...].astype(jnp.float32)
    mel_t = mel_t_ref[...].astype(jnp.float32)
    mel_m = mel_m_ref[...].astype(jnp.float32)
    if valid is not None:
        mel_m = mel_m * valid
    row_l1 = jnp.sum(jnp.abs(mel_p - mel_t), axis=-1)                 # [B, T_TILE]
    acc_ref[0] += jnp.sum(row_l1 * mel_m)
    acc_ref[1] += jnp.sum(mel_m)

    # -------- KL: accumulate sum((0.5*z_p^2 - logs_q) * mask) and sum(mask) -----
    # The "-0.5" constant is added analytically at finalize.
    zp = zp_ref[...].astype(jnp.float32)
    lq = lq_ref[...].astype(jnp.float32)
    klm = klm_ref[...].astype(jnp.float32)
    if valid is not None:
        klm = klm * valid
    acc_ref[2] += jnp.sum((0.5 * zp * zp - lq) * klm[:, None, :])
    acc_ref[3] += jnp.sum(klm)

    # -------- MLE partials: 0.5*sum(z^2) and sum(logdet) --------
    z = z_ref[...].astype(jnp.float32)
    logdet = logdet_ref[...].astype(jnp.float32)
    if valid is not None:
        acc_ref[4] += 0.5 * jnp.sum(z * z * valid[:, None, :])
        acc_ref[5] += jnp.sum(logdet * valid)
    else:
        acc_ref[4] += 0.5 * jnp.sum(z * z)
        acc_ref[5] += jnp.sum(logdet)

    # -------- finalize on the last T tile --------
    @pl.when(t == n_t - 1)
    def _finalize():
        # Duration MSE on the tiny resident [B, T_src] tensors (computed once).
        ldp = ldp_ref[...].astype(jnp.float32)
        ldt = jnp.log(dur_ref[...].astype(jnp.float32) + 1.0)
        swm = swm_ref[...].astype(jnp.float32)
        dd = ldp - ldt
        duration_loss = jnp.sum(dd * dd * swm) / jnp.sum(swm)

        mel_cnt = acc_ref[1]
        mel_loss = acc_ref[0] / (mel_cnt * float(n_mels))

        kl_cnt = acc_ref[3]
        kl_loss = (acc_ref[2] - 0.5 * float(d_latent) * kl_cnt) / kl_cnt

        postnet_loss = (acc_ref[4] - acc_ref[5]) / float(n_post_elems) \
            + 0.5 * math.log(2.0 * math.pi)

        total_loss = mel_loss + kl_loss + postnet_loss + duration_loss

        out_ref[0] = total_loss
        out_ref[1] = mel_loss
        out_ref[2] = kl_loss
        out_ref[3] = postnet_loss
        out_ref[4] = duration_loss


def portaspeech_loss(
    mel_predictions, mel_targets, mel_mask,
    log_duration_predictions, duration_roundeds, src_w_mask,
    z_p, logs_q, kl_mask,
    z, logdet,
    *, t_tile=256,
):
    """Returns (total_loss, mel_loss, kl_loss, postnet_loss, duration_loss)."""
    B, T, M = mel_predictions.shape
    S = log_duration_predictions.shape[1]
    D_lat = z_p.shape[1]
    D_post = z.shape[1]

    def _mask(m):
        # Bool refs are avoided for lowering robustness; masks are tiny
        # ([B,T] / [B,S], ~1/n_mels of the mel traffic) so this costs ~nothing.
        return m.astype(jnp.float32) if m.dtype == jnp.bool_ else m

    mel_mask = _mask(mel_mask)
    src_w_mask = _mask(src_w_mask)
    kl_mask = _mask(kl_mask)

    # Choose the T tile: whole sequence if small, otherwise 128-aligned tiles
    # (keeps block shapes legal and VMEM per step to a few MB).
    if T <= t_tile:
        tt = T
    else:
        tt = max(128, (t_tile // 128) * 128)
    num_t = pl.cdiv(T, tt)
    partial_last = (T % tt) != 0

    kernel = functools.partial(
        _portaspeech_loss_kernel,
        t_tile=tt,
        t_total=T,
        n_mels=M,                       # global normalizers, NOT block shapes
        d_latent=D_lat,
        n_post_elems=B * D_post * T,
        partial_last=partial_last,
    )

    grid_spec = pltpu.PrefetchScalarGridSpec(
        num_scalar_prefetch=0,
        grid=(num_t,),
        in_specs=[
            pl.BlockSpec((B, tt, M), lambda t: (0, t, 0)),        # mel_predictions
            pl.BlockSpec((B, tt, M), lambda t: (0, t, 0)),        # mel_targets
            pl.BlockSpec((B, tt), lambda t: (0, t)),              # mel_mask
            pl.BlockSpec((B, S), lambda t: (0, 0)),               # log_dur_pred (resident)
            pl.BlockSpec((B, S), lambda t: (0, 0)),               # duration_rounded
            pl.BlockSpec((B, S), lambda t: (0, 0)),               # src_w_mask
            pl.BlockSpec((B, D_lat, tt), lambda t: (0, 0, t)),    # z_p
            pl.BlockSpec((B, D_lat, tt), lambda t: (0, 0, t)),    # logs_q
            pl.BlockSpec((B, tt), lambda t: (0, t)),              # kl_mask
            pl.BlockSpec((B, D_post, tt), lambda t: (0, 0, t)),   # z
            pl.BlockSpec((B, tt), lambda t: (0, t)),              # logdet
        ],
        out_specs=pl.BlockSpec(memory_space=pltpu.MemorySpace.SMEM),
        scratch_shapes=[pltpu.SMEM((6,), jnp.float32)],
    )

    out = pl.pallas_call(
        kernel,
        out_shape=jax.ShapeDtypeStruct((5,), jnp.float32),
        grid_spec=grid_spec,
        compiler_params=pltpu.CompilerParams(
            dimension_semantics=("arbitrary",),     # reduction axis
            vmem_limit_bytes=32 * 1024 * 1024,      # fits v5e/v6e/v7x with tt<=256
        ),
    )(
        mel_predictions, mel_targets, mel_mask,
        log_duration_predictions, duration_roundeds, src_w_mask,
        z_p, logs_q, kl_mask,
        z, logdet,
    )
    return out[0], out[1], out[2], out[3], out[4]


def _reference_loss(mel_p, mel_t, mel_m, ldp, dur, swm, zp, lq, klm, z, logdet):
    """Pure-JAX replica of PortaSpeechLoss.forward for a numeric sanity check."""
    mel_m = mel_m.astype(jnp.float32)
    swm = swm.astype(jnp.float32)
    klm = klm.astype(jnp.float32)
    mel_p = mel_p.astype(jnp.float32)
    mel_t = mel_t.astype(jnp.float32)
    n_mels = mel_p.shape[-1]
    mel_loss = jnp.sum(jnp.abs(mel_p - mel_t) * mel_m[:, :, None]) / (jnp.sum(mel_m) * n_mels)
    ldt = jnp.log(dur.astype(jnp.float32) + 1.0)
    duration_loss = jnp.sum(((ldp.astype(jnp.float32) - ldt) ** 2) * swm) / jnp.sum(swm)
    kl = (-lq.astype(jnp.float32) - 0.5) + 0.5 * zp.astype(jnp.float32) ** 2
    kl_loss = jnp.sum(kl * klm[:, None, :]) / jnp.sum(klm)
    z = z.astype(jnp.float32)
    postnet_loss = (0.5 * jnp.sum(z ** 2) - jnp.sum(logdet.astype(jnp.float32))) / z.size \
        + 0.5 * math.log(2 * math.pi)
    total = mel_loss + kl_loss + postnet_loss + duration_loss
    return total, mel_loss, kl_loss, postnet_loss, duration_loss


if __name__ == "__main__":
    # Small shapes consistent with the module's forward.
    B, T_MEL, N_MELS = 2, 16, 8
    T_SRC = 8
    D_LAT = 4     # latent dim of (z_p, logs_q)
    D_POST = 4    # postnet flow dim of z

    key = jax.random.PRNGKey(0)
    ks = jax.random.split(key, 8)

    mel_predictions = jax.random.normal(ks[0], (B, T_MEL, N_MELS), jnp.float32)
    mel_targets = jax.random.normal(ks[1], (B, T_MEL, N_MELS), jnp.float32)

    mel_lengths = jnp.array([T_MEL, 12], dtype=jnp.int32)
    mel_mask = (jnp.arange(T_MEL)[None, :] < mel_lengths[:, None])          # [B, T_mel] bool

    log_duration_predictions = jax.random.normal(ks[2], (B, T_SRC), jnp.float32)
    duration_roundeds = jax.random.randint(ks[3], (B, T_SRC), 0, 6)          # int32 (native)
    src_lengths = jnp.array([T_SRC, 6], dtype=jnp.int32)
    src_w_mask = (jnp.arange(T_SRC)[None, :] < src_lengths[:, None])        # [B, T_src] bool

    z_p = jax.random.normal(ks[4], (B, D_LAT, T_MEL), jnp.float32)
    logs_q = 0.1 * jax.random.normal(ks[5], (B, D_LAT, T_MEL), jnp.float32)
    kl_mask = mel_mask                                                      # dist_info mask [B,1,T] squeezed

    z = jax.random.normal(ks[6], (B, D_POST, T_MEL), jnp.float32)
    logdet = 0.05 * jax.random.normal(ks[7], (B, T_MEL), jnp.float32)

    losses = portaspeech_loss(
        mel_predictions, mel_targets, mel_mask,
        log_duration_predictions, duration_roundeds, src_w_mask,
        z_p, logs_q, kl_mask,
        z, logdet,
    )
    losses = jax.block_until_ready(losses)

    ref = _reference_loss(
        mel_predictions, mel_targets, mel_mask,
        log_duration_predictions, duration_roundeds, src_w_mask,
        z_p, logs_q, kl_mask,
        z, logdet,
    )
    for got, want in zip(losses, ref):
        assert jnp.allclose(got, want, rtol=1e-3, atol=1e-3), (got, want)

    print("KERNEL_OK")
</pallas_src>

<mosaic_0001>
module attributes {stable_mosaic.version = 11 : i64} {
  func.func @_portaspeech_loss_kernel(%arg0: i32, %arg1: memref<2x16x8xf32, #tpu.memory_space<vmem>>, %arg2: memref<2x16x8xf32, #tpu.memory_space<vmem>>, %arg3: memref<2x16xf32, #tpu.memory_space<vmem>>, %arg4: memref<2x8xf32, #tpu.memory_space<vmem>>, %arg5: memref<2x8xi32, #tpu.memory_space<vmem>>, %arg6: memref<2x8xf32, #tpu.memory_space<vmem>>, %arg7: memref<2x4x16xf32, #tpu.memory_space<vmem>>, %arg8: memref<2x4x16xf32, #tpu.memory_space<vmem>>, %arg9: memref<2x16xf32, #tpu.memory_space<vmem>>, %arg10: memref<2x4x16xf32, #tpu.memory_space<vmem>>, %arg11: memref<2x16xf32, #tpu.memory_space<vmem>>, %arg12: memref<5xf32, #tpu.memory_space<smem>>, %arg13: memref<6xf32, #tpu.memory_space<smem>>) attributes {dimension_semantics = [#tpu.dimension_semantics<arbitrary>], iteration_bounds = array<i64: 1>, scalar_prefetch = 0 : i64, scratch_operands = 1 : i64, tpu.core_type = #tpu.core_type<tc>, window_params = [{transform_indices = @transform_0, window_bounds = array<i64: 2, 16, 8>}, {transform_indices = @transform_1, window_bounds = array<i64: 2, 16, 8>}, {transform_indices = @transform_2, window_bounds = array<i64: 2, 16>}, {pipeline_mode = #tpu.pipeline_mode<synchronous>, transform_indices = @transform_3, window_bounds = array<i64: 2, 8>}, {pipeline_mode = #tpu.pipeline_mode<synchronous>, transform_indices = @transform_4, window_bounds = array<i64: 2, 8>}, {pipeline_mode = #tpu.pipeline_mode<synchronous>, transform_indices = @transform_5, window_bounds = array<i64: 2, 8>}, {transform_indices = @transform_6, window_bounds = array<i64: 2, 4, 16>}, {transform_indices = @transform_7, window_bounds = array<i64: 2, 4, 16>}, {transform_indices = @transform_8, window_bounds = array<i64: 2, 16>}, {transform_indices = @transform_9, window_bounds = array<i64: 2, 4, 16>}, {transform_indices = @transform_10, window_bounds = array<i64: 2, 16>}, {transform_indices = @transform_11, window_bounds = array<i64: 5>}]} {
    %c0_i32 = arith.constant 0 : i32
    %0 = arith.cmpi eq, %arg0, %c0_i32 : i32
    %1 = arith.extui %0 : i1 to i32
    %c0_i32_0 = arith.constant 0 : i32
    %2 = arith.cmpi ne, %1, %c0_i32_0 : i32
    scf.if %2 {
      %cst_38 = arith.constant 0.000000e+00 : f32
      %c0_39 = arith.constant 0 : index
      %69 = memref.load %arg13[%c0_39] : memref<6xf32, #tpu.memory_space<smem>>
      memref.store %cst_38, %arg13[%c0_39] : memref<6xf32, #tpu.memory_space<smem>>
      %cst_40 = arith.constant 0.000000e+00 : f32
      %c1_41 = arith.constant 1 : index
      %70 = memref.load %arg13[%c1_41] : memref<6xf32, #tpu.memory_space<smem>>
      memref.store %cst_40, %arg13[%c1_41] : memref<6xf32, #tpu.memory_space<smem>>
      %cst_42 = arith.constant 0.000000e+00 : f32
      %c2_43 = arith.constant 2 : index
      %71 = memref.load %arg13[%c2_43] : memref<6xf32, #tpu.memory_space<smem>>
      memref.store %cst_42, %arg13[%c2_43] : memref<6xf32, #tpu.memory_space<smem>>
      %cst_44 = arith.constant 0.000000e+00 : f32
      %c3_45 = arith.constant 3 : index
      %72 = memref.load %arg13[%c3_45] : memref<6xf32, #tpu.memory_space<smem>>
      memref.store %cst_44, %arg13[%c3_45] : memref<6xf32, #tpu.memory_space<smem>>
      %cst_46 = arith.constant 0.000000e+00 : f32
      %c4_47 = arith.constant 4 : index
      %73 = memref.load %arg13[%c4_47] : memref<6xf32, #tpu.memory_space<smem>>
      memref.store %cst_46, %arg13[%c4_47] : memref<6xf32, #tpu.memory_space<smem>>
      %cst_48 = arith.constant 0.000000e+00 : f32
      %c5_49 = arith.constant 5 : index
      %74 = memref.load %arg13[%c5_49] : memref<6xf32, #tpu.memory_space<smem>>
      memref.store %cst_48, %arg13[%c5_49] : memref<6xf32, #tpu.memory_space<smem>>
    } else {
    }
    %c0 = arith.constant 0 : index
    %c0_1 = arith.constant 0 : index
    %c0_2 = arith.constant 0 : index
    %3 = vector.load %arg1[%c0, %c0_1, %c0_2] : memref<2x16x8xf32, #tpu.memory_space<vmem>>, vector<2x16x8xf32>
    %c0_3 = arith.constant 0 : index
    %c0_4 = arith.constant 0 : index
    %c0_5 = arith.constant 0 : index
    %4 = vector.load %arg2[%c0_3, %c0_4, %c0_5] : memref<2x16x8xf32, #tpu.memory_space<vmem>>, vector<2x16x8xf32>
    %c0_6 = arith.constant 0 : index
    %c0_7 = arith.constant 0 : index
    %5 = vector.load %arg3[%c0_6, %c0_7] : memref<2x16xf32, #tpu.memory_space<vmem>>, vector<2x16xf32>
    %6 = arith.subf %3, %4 : vector<2x16x8xf32>
    %7 = math.absf %6 : vector<2x16x8xf32>
    %cst = arith.constant dense<0.000000e+00> : vector<2x16xf32>
    %8 = vector.multi_reduction <add>, %7, %cst [2] : vector<2x16x8xf32> to vector<2x16xf32>
    %c0_8 = arith.constant 0 : index
    %9 = memref.load %arg13[%c0_8] : memref<6xf32, #tpu.memory_space<smem>>
    %10 = arith.mulf %8, %5 : vector<2x16xf32>
    %11 = vector.shape_cast %10 : vector<2x16xf32> to vector<1x2x16xf32>
    %cst_9 = arith.constant dense<0.000000e+00> : vector<1xf32>
    %12 = vector.multi_reduction <add>, %11, %cst_9 [1, 2] : vector<1x2x16xf32> to vector<1xf32>
    %13 = vector.shape_cast %12 : vector<1xf32> to vector<1x1x1xf32>
    %14 = vector.extract %13[0, 0, 0] : f32 from vector<1x1x1xf32>
    %15 = arith.addf %9, %14 : f32
    %c0_10 = arith.constant 0 : index
    %16 = memref.load %arg13[%c0_10] : memref<6xf32, #tpu.memory_space<smem>>
    memref.store %15, %arg13[%c0_10] : memref<6xf32, #tpu.memory_space<smem>>
    %c1 = arith.constant 1 : index
    %17 = memref.load %arg13[%c1] : memref<6xf32, #tpu.memory_space<smem>>
    %18 = vector.shape_cast %5 : vector<2x16xf32> to vector<1x2x16xf32>
    %cst_11 = arith.constant dense<0.000000e+00> : vector<1xf32>
    %19 = vector.multi_reduction <add>, %18, %cst_11 [1, 2] : vector<1x2x16xf32> to vector<1xf32>
    %20 = vector.shape_cast %19 : vector<1xf32> to vector<1x1x1xf32>
    %21 = vector.extract %20[0, 0, 0] : f32 from vector<1x1x1xf32>
    %22 = arith.addf %17, %21 : f32
    %c1_12 = arith.constant 1 : index
    %23 = memref.load %arg13[%c1_12] : memref<6xf32, #tpu.memory_space<smem>>
    memref.store %22, %arg13[%c1_12] : memref<6xf32, #tpu.memory_space<smem>>
    %c0_13 = arith.constant 0 : index
    %c0_14 = arith.constant 0 : index
    %c0_15 = arith.constant 0 : index
    %24 = vector.load %arg7[%c0_13, %c0_14, %c0_15] : memref<2x4x16xf32, #tpu.memory_space<vmem>>, vector<2x4x16xf32>
    %c0_16 = arith.constant 0 : index
    %c0_17 = arith.constant 0 : index
    %c0_18 = arith.constant 0 : index
    %25 = vector.load %arg8[%c0_16, %c0_17, %c0_18] : memref<2x4x16xf32, #tpu.memory_space<vmem>>, vector<2x4x16xf32>
    %c0_19 = arith.constant 0 : index
    %c0_20 = arith.constant 0 : index
    %26 = vector.load %arg9[%c0_19, %c0_20] : memref<2x16xf32, #tpu.memory_space<vmem>>, vector<2x16xf32>
    %c2 = arith.constant 2 : index
    %27 = memref.load %arg13[%c2] : memref<6xf32, #tpu.memory_space<smem>>
    %cst_21 = arith.constant 5.000000e-01 : f32
    %28 = vector.broadcast %cst_21 : f32 to vector<2x4x16xf32>
    %29 = arith.mulf %28, %24 : vector<2x4x16xf32>
    %30 = arith.mulf %29, %24 : vector<2x4x16xf32>
    %31 = arith.subf %30, %25 : vector<2x4x16xf32>
    %32 = vector.shape_cast %26 : vector<2x16xf32> to vector<2x1x16xf32>
    %33 = vector.broadcast %32 : vector<2x1x16xf32> to vector<2x4x16xf32>
    %34 = arith.mulf %31, %33 : vector<2x4x16xf32>
    %35 = vector.shape_cast %34 : vector<2x4x16xf32> to vector<1x2x4x16xf32>
    %cst_22 = arith.constant dense<0.000000e+00> : vector<1xf32>
    %36 = vector.multi_reduction <add>, %35, %cst_22 [1, 2, 3] : vector<1x2x4x16xf32> to vector<1xf32>
    %37 = vector.shape_cast %36 : vector<1xf32> to vector<1x1x1x1xf32>
    %38 = vector.extract %37[0, 0, 0, 0] : f32 from vector<1x1x1x1xf32>
    %39 = arith.addf %27, %38 : f32
    %c2_23 = arith.constant 2 : index
    %40 = memref.load %arg13[%c2_23] : memref<6xf32, #tpu.memory_space<smem>>
    memref.store %39, %arg13[%c2_23] : memref<6xf32, #tpu.memory_space<smem>>
    %c3 = arith.constant 3 : index
    %41 = memref.load %arg13[%c3] : memref<6xf32, #tpu.memory_space<smem>>
    %42 = vector.shape_cast %26 : vector<2x16xf32> to vector<1x2x16xf32>
    %cst_24 = arith.constant dense<0.000000e+00> : vector<1xf32>
    %43 = vector.multi_reduction <add>, %42, %cst_24 [1, 2] : vector<1x2x16xf32> to vector<1xf32>
    %44 = vector.shape_cast %43 : vector<1xf32> to vector<1x1x1xf32>
    %45 = vector.extract %44[0, 0, 0] : f32 from vector<1x1x1xf32>
    %46 = arith.addf %41, %45 : f32
    %c3_25 = arith.constant 3 : index
    %47 = memref.load %arg13[%c3_25] : memref<6xf32, #tpu.memory_space<smem>>
    memref.store %46, %arg13[%c3_25] : memref<6xf32, #tpu.memory_space<smem>>
    %c0_26 = arith.constant 0 : index
    %c0_27 = arith.constant 0 : index
    %c0_28 = arith.constant 0 : index
    %48 = vector.load %arg10[%c0_26, %c0_27, %c0_28] : memref<2x4x16xf32, #tpu.memory_space<vmem>>, vector<2x4x16xf32>
    %c0_29 = arith.constant 0 : index
    %c0_30 = arith.constant 0 : index
    %49 = vector.load %arg11[%c0_29, %c0_30] : memref<2x16xf32, #tpu.memory_space<vmem>>, vector<2x16xf32>
    %c4 = arith.constant 4 : index
    %50 = memref.load %arg13[%c4] : memref<6xf32, #tpu.memory_space<smem>>
    %51 = arith.mulf %48, %48 : vector<2x4x16xf32>
    %52 = vector.shape_cast %51 : vector<2x4x16xf32> to vector<1x2x4x16xf32>
    %cst_31 = arith.constant dense<0.000000e+00> : vector<1xf32>
    %53 = vector.multi_reduction <add>, %52, %cst_31 [1, 2, 3] : vector<1x2x4x16xf32> to vector<1xf32>
    %54 = vector.shape_cast %53 : vector<1xf32> to vector<1x1x1x1xf32>
    %55 = vector.extract %54[0, 0, 0, 0] : f32 from vector<1x1x1x1xf32>
    %cst_32 = arith.constant 5.000000e-01 : f32
    %56 = arith.mulf %cst_32, %55 : f32
    %57 = arith.addf %50, %56 : f32
    %c4_33 = arith.constant 4 : index
    %58 = memref.load %arg13[%c4_33] : memref<6xf32, #tpu.memory_space<smem>>
    memref.store %57, %arg13[%c4_33] : memref<6xf32, #tpu.memory_space<smem>>
    %c5 = arith.constant 5 : index
    %59 = memref.load %arg13[%c5] : memref<6xf32, #tpu.memory_space<smem>>
    %60 = vector.shape_cast %49 : vector<2x16xf32> to vector<1x2x16xf32>
    %cst_34 = arith.constant dense<0.000000e+00> : vector<1xf32>
    %61 = vector.multi_reduction <add>, %60, %cst_34 [1, 2] : vector<1x2x16xf32> to vector<1xf32>
    %62 = vector.shape_cast %61 : vector<1xf32> to vector<1x1x1xf32>
    %63 = vector.extract %62[0, 0, 0] : f32 from vector<1x1x1xf32>
    %64 = arith.addf %59, %63 : f32
    %c5_35 = arith.constant 5 : index
    %65 = memref.load %arg13[%c5_35] : memref<6xf32, #tpu.memory_space<smem>>
    memref.store %64, %arg13[%c5_35] : memref<6xf32, #tpu.memory_space<smem>>
    %c0_i32_36 = arith.constant 0 : i32
    %66 = arith.cmpi eq, %arg0, %c0_i32_36 : i32
    %67 = arith.extui %66 : i1 to i32
    %c0_i32_37 = arith.constant 0 : i32
    %68 = arith.cmpi ne, %67, %c0_i32_37 : i32
    scf.if %68 {
      %c0_38 = arith.constant 0 : index
      %c0_39 = arith.constant 0 : index
      %69 = vector.load %arg4[%c0_38, %c0_39] : memref<2x8xf32, #tpu.memory_space<vmem>>, vector<2x8xf32>
      %c0_40 = arith.constant 0 : index
      %c0_41 = arith.constant 0 : index
      %70 = vector.load %arg5[%c0_40, %c0_41] : memref<2x8xi32, #tpu.memory_space<vmem>>, vector<2x8xi32>
      %71 = arith.sitofp %70 : vector<2x8xi32> to vector<2x8xf32>
      %cst_42 = arith.constant 1.000000e+00 : f32
      %72 = vector.broadcast %cst_42 : f32 to vector<2x8xf32>
      %73 = arith.addf %71, %72 : vector<2x8xf32>
      %74 = math.log %73 : vector<2x8xf32>
      %c0_43 = arith.constant 0 : index
      %c0_44 = arith.constant 0 : index
      %75 = vector.load %arg6[%c0_43, %c0_44] : memref<2x8xf32, #tpu.memory_space<vmem>>, vector<2x8xf32>
      %76 = arith.subf %69, %74 : vector<2x8xf32>
      %77 = arith.mulf %76, %76 : vector<2x8xf32>
      %78 = arith.mulf %77, %75 : vector<2x8xf32>
      %79 = vector.shape_cast %78 : vector<2x8xf32> to vector<1x2x8xf32>
      %cst_45 = arith.constant dense<0.000000e+00> : vector<1xf32>
      %80 = vector.multi_reduction <add>, %79, %cst_45 [1, 2] : vector<1x2x8xf32> to vector<1xf32>
      %81 = vector.shape_cast %80 : vector<1xf32> to vector<1x1x1xf32>
      %82 = vector.extract %81[0, 0, 0] : f32 from vector<1x1x1xf32>
      %83 = vector.shape_cast %75 : vector<2x8xf32> to vector<1x2x8xf32>
      %cst_46 = arith.constant dense<0.000000e+00> : vector<1xf32>
      %84 = vector.multi_reduction <add>, %83, %cst_46 [1, 2] : vector<1x2x8xf32> to vector<1xf32>
      %85 = vector.shape_cast %84 : vector<1xf32> to vector<1x1x1xf32>
      %86 = vector.extract %85[0, 0, 0] : f32 from vector<1x1x1xf32>
      %87 = arith.divf %82, %86 : f32
      %c1_47 = arith.constant 1 : index
      %88 = memref.load %arg13[%c1_47] : memref<6xf32, #tpu.memory_space<smem>>
      %c0_48 = arith.constant 0 : index
      %89 = memref.load %arg13[%c0_48] : memref<6xf32, #tpu.memory_space<smem>>
      %cst_49 = arith.constant 8.000000e+00 : f32
      %90 = arith.mulf %88, %cst_49 : f32
      %91 = arith.divf %89, %90 : f32
      %c3_50 = arith.constant 3 : index
      %92 = memref.load %arg13[%c3_50] : memref<6xf32, #tpu.memory_space<smem>>
      %c2_51 = arith.constant 2 : index
      %93 = memref.load %arg13[%c2_51] : memref<6xf32, #tpu.memory_space<smem>>
      %cst_52 = arith.constant 2.000000e+00 : f32
      %94 = arith.mulf %cst_52, %92 : f32
      %95 = arith.subf %93, %94 : f32
      %96 = arith.divf %95, %92 : f32
      %c4_53 = arith.constant 4 : index
      %97 = memref.load %arg13[%c4_53] : memref<6xf32, #tpu.memory_space<smem>>
      %c5_54 = arith.constant 5 : index
      %98 = memref.load %arg13[%c5_54] : memref<6xf32, #tpu.memory_space<smem>>
      %99 = arith.subf %97, %98 : f32
      %cst_55 = arith.constant 1.280000e+02 : f32
      %100 = arith.divf %99, %cst_55 : f32
      %cst_56 = arith.constant 0.918938517 : f32
      %101 = arith.addf %100, %cst_56 : f32
      %102 = arith.addf %91, %96 : f32
      %103 = arith.addf %102, %101 : f32
      %104 = arith.addf %103, %87 : f32
      %c0_57 = arith.constant 0 : index
      %105 = memref.load %arg12[%c0_57] : memref<5xf32, #tpu.memory_space<smem>>
      memref.store %104, %arg12[%c0_57] : memref<5xf32, #tpu.memory_space<smem>>
      %c1_58 = arith.constant 1 : index
      %106 = memref.load %arg12[%c1_58] : memref<5xf32, #tpu.memory_space<smem>>
      memref.store %91, %arg12[%c1_58] : memref<5xf32, #tpu.memory_space<smem>>
      %c2_59 = arith.constant 2 : index
      %107 = memref.load %arg12[%c2_59] : memref<5xf32, #tpu.memory_space<smem>>
      memref.store %96, %arg12[%c2_59] : memref<5xf32, #tpu.memory_space<smem>>
      %c3_60 = arith.constant 3 : index
      %108 = memref.load %arg12[%c3_60] : memref<5xf32, #tpu.memory_space<smem>>
      memref.store %101, %arg12[%c3_60] : memref<5xf32, #tpu.memory_space<smem>>
      %c4_61 = arith.constant 4 : index
      %109 = memref.load %arg12[%c4_61] : memref<5xf32, #tpu.memory_space<smem>>
      memref.store %87, %arg12[%c4_61] : memref<5xf32, #tpu.memory_space<smem>>
    } else {
    }
    return
  }
  func.func @transform_0(%arg0: i32) -> (i32, i32, i32) {
    %c0_i32 = arith.constant 0 : i32
    %c0_i32_0 = arith.constant 0 : i32
    %c0_i32_1 = arith.constant 0 : i32
    return %c0_i32, %arg0, %c0_i32_0 : i32, i32, i32
  }
  func.func @transform_1(%arg0: i32) -> (i32, i32, i32) {
    %c0_i32 = arith.constant 0 : i32
    %c0_i32_0 = arith.constant 0 : i32
    %c0_i32_1 = arith.constant 0 : i32
    return %c0_i32, %arg0, %c0_i32_0 : i32, i32, i32
  }
  func.func @transform_2(%arg0: i32) -> (i32, i32) {
    %c0_i32 = arith.constant 0 : i32
    %c0_i32_0 = arith.constant 0 : i32
    return %c0_i32, %arg0 : i32, i32
  }
  func.func @transform_3(%arg0: i32) -> (i32, i32) {
    %c0_i32 = arith.constant 0 : i32
    %c0_i32_0 = arith.constant 0 : i32
    %c0_i32_1 = arith.constant 0 : i32
    return %c0_i32, %c0_i32_0 : i32, i32
  }
  func.func @transform_4(%arg0: i32) -> (i32, i32) {
    %c0_i32 = arith.constant 0 : i32
    %c0_i32_0 = arith.constant 0 : i32
    %c0_i32_1 = arith.constant 0 : i32
    return %c0_i32, %c0_i32_0 : i32, i32
  }
  func.func @transform_5(%arg0: i32) -> (i32, i32) {
    %c0_i32 = arith.constant 0 : i32
    %c0_i32_0 = arith.constant 0 : i32
    %c0_i32_1 = arith.constant 0 : i32
    return %c0_i32, %c0_i32_0 : i32, i32
  }
  func.func @transform_6(%arg0: i32) -> (i32, i32, i32) {
    %c0_i32 = arith.constant 0 : i32
    %c0_i32_0 = arith.constant 0 : i32
    %c0_i32_1 = arith.constant 0 : i32
    return %c0_i32, %c0_i32_0, %arg0 : i32, i32, i32
  }
  func.func @transform_7(%arg0: i32) -> (i32, i32, i32) {
    %c0_i32 = arith.constant 0 : i32
    %c0_i32_0 = arith.constant 0 : i32
    %c0_i32_1 = arith.constant 0 : i32
    return %c0_i32, %c0_i32_0, %arg0 : i32, i32, i32
  }
  func.func @transform_8(%arg0: i32) -> (i32, i32) {
    %c0_i32 = arith.constant 0 : i32
    %c0_i32_0 = arith.constant 0 : i32
    return %c0_i32, %arg0 : i32, i32
  }
  func.func @transform_9(%arg0: i32) -> (i32, i32, i32) {
    %c0_i32 = arith.constant 0 : i32
    %c0_i32_0 = arith.constant 0 : i32
    %c0_i32_1 = arith.constant 0 : i32
    return %c0_i32, %c0_i32_0, %arg0 : i32, i32, i32
  }
  func.func @transform_10(%arg0: i32) -> (i32, i32) {
    %c0_i32 = arith.constant 0 : i32
    %c0_i32_0 = arith.constant 0 : i32
    return %c0_i32, %arg0 : i32, i32
  }
  func.func @transform_11(%arg0: i32) -> i32 {
    %c0_i32 = arith.constant 0 : i32
    %c0_i32_0 = arith.constant 0 : i32
    return %c0_i32 : i32
  }
}

</mosaic_0001>

<bundles_post_ra>
// kernel: tpu_custom_call.1
= control target key start
LH: loop header
LB: loop body
LE: loop exit
PB: predicated region body
PF: predicated region fallthrough
CT: control target
= control target key end

     0   :  { %v88_v3 = vlaneseq  ;;  %vm72_vm0 = vcmask 64512   ;;  %s624_s0 = inlined_call_operand.vmem [shape: f32[2,16,8], index: 0, kind: input, shape index: {}]   ;;  %s625_s1 = inlined_call_operand.vmem [shape: f32[2,16,8], index: 1, kind: input, shape index: {}]   ;;  %s626_s2 = inlined_call_operand.vmem [shape: f32[2,16], index: 2, kind: input, shape index: {}]   ;;  %s627_s3 = inlined_call_operand.vmem [shape: f32[2,8], index: 3, kind: input, shape index: {}]   ;;  %s628_s4 = inlined_call_operand.vmem [shape: s32[2,8], index: 4, kind: input, shape index: {}]   ;;  %s629_s5 = inlined_call_operand.vmem [shape: f32[2,8], index: 5, kind: input, shape index: {}]   ;;  %s630_s6 = inlined_call_operand.vmem [shape: f32[2,4,16], index: 6, kind: input, shape index: {}]   ;;  %s631_s7 = inlined_call_operand.vmem [shape: f32[2,4,16], index: 7, kind: input, shape index: {}]   ;;  %s632_s8 = inlined_call_operand.vmem [shape: f32[2,16], index: 8, kind: input, shape index: {}]   ;;  %s633_s9 = inlined_call_operand.vmem [shape: f32[2,4,16], index: 9, kind: input, shape index: {}]   ;;  %s634_s10 = inlined_call_operand.vmem [shape: f32[2,16], index: 10, kind: input, shape index: {}]   ;;  %s635_s11 = inlined_call_operand.hbm [shape: f32[5], index: 11, kind: output, shape index: {}]  }
   0x1   :  { %v57_v0 = vld [vmem:[%s624_s0 + $0x10] sm:$0xff]  ;;  %v55_v2 = vld [vmem:[%s624_s0] sm:$0xff]  ;;  %v58_v6 = vld [vmem:[%s624_s0 + $0x18] sm:$0xff] }
   0x2   :  { %v61_v1 = vld [vmem:[%s625_s1 + $0x10] sm:$0xff]  ;;  %v59_v5 = vld [vmem:[%s625_s1] sm:$0xff]  ;;  %v62_v7 = vld [vmem:[%s625_s1 + $0x18] sm:$0xff]  ;;  %v89_v11 = vshrl.u32 %v88_v3, 7 }
   0x3   :  { %v66_v4 = vsub.f32 %v57_v0, %v61_v1  ;;  %v64_v8 = vsub.f32 %v55_v2, %v59_v5  ;;  %v56_v9 = vld [vmem:[%s624_s0 + $0x8] sm:$0xff]  ;;  %v67_v13 = vsub.f32 %v58_v6, %v62_v7 }
   0x4   :  { %v60_v10 = vld [vmem:[%s625_s1 + $0x8] sm:$0xff] }
   0x5   :  { %v70_v12 = vand.u32 2147483647, %v66_v4 }
   0x6   :  { %16 = vsyncpa [#allocation4], 0  ;;  %v68_v14 = vand.u32 2147483647, %v64_v8  ;;  %v65_v15 = vsub.f32 %v56_v9, %v60_v10  ;;  %434 = vset.pattern.permute.xlu2 %v89_v11  ;;  %436 = vset.pattern.permute.xlu0 %v89_v11  ;;  %v96_v16 = vadd.s32 8, %v89_v11  ;;  %v464_v26 = vmov 0  }
   0x7   :  { %v79_v17 = vsel %vm72_vm0, %v70_v12, 0.0  ;;  %v63_v18 = vld [vmem:[%s626_s2] sm:$0x3]  ;;  %v71_v20 = vand.u32 2147483647, %v67_v13  ;;  %vm150_vm1 = vcmask 123904  }
   0x8   :  { %80 = vadd.xlane.f32.xlu1 %v79_v17  ;;  %v73_v19 = vsel %vm72_vm0, %v68_v14, 0.0  ;;  %v69_v21 = vand.u32 2147483647, %v65_v15  ;;  %v87_v22 = vperm.slane %v63_v18, 0  ;;  %v100_v25 = vperm.slane %v63_v18, 1  ;;  %s387_s26 = sshll.u32 %s635_s11, 4  ;;  %s388_s26 = int_to_ptr.hbm [resolvable:$true] %s387_s26 }
   0x9   :  { %74 = vadd.xlane.f32.xlu0 %v73_v19  ;;  %437 = vset.pattern.permute.xlu1 %v96_v16  ;;  %v82_v23 = vsel %vm72_vm0, %v71_v20, 0.0  ;;  %v182_v39 = vld [vmem:[%s632_s8] sm:$0x3]  ;;  %v165_v41 = vsel %vm150_vm1, %v63_v18, 0.0  ;;  %v179_v45 = vld [vmem:[%s630_s6 + $0x4] sm:$0xf] }
   0xa   :  { %v76_v24 = vsel %vm72_vm0, %v69_v21, 0.0  ;;  %v215_v40 = vsel %vm150_vm1, %v182_v39, 0.0  ;;  %v191_v42 = vrot.slane %v182_v39, 1  ;;  %v268_v43 = vld [vmem:[%s628_s4] sm:$0x3]  ;;  %v185_v48 = vmul.f32 0.5, %v179_v45 }
   0xb   :  { %v178_v44 = vld [vmem:[%s630_s6] sm:$0xf]  ;;  %v269_v46 = vcvt.s32.f32 %v268_v43  ;;  %v192_v50 = vperm.slane %v182_v39, 0  ;;  %v181_v55 = vld [vmem:[%s631_s7 + $0x4] sm:$0xf]  ;;  %vm198_vm2 = vcmask 125952  }
   0xc   :  { %v184_v47 = vmul.f32 0.5, %v178_v44  ;;  %v193_v51 = vperm.slane %v191_v42, 0  ;;  %v187_v53 = vmul.f32 %v185_v48, %v179_v45  ;;  %v180_v54 = vld [vmem:[%s631_s7] sm:$0xf]  ;;  %v229_v59 = vld [vmem:[%s633_s9 + $0x4] sm:$0xf] }
   0xd   :  { %v270_v49 = vadd.f32 1.0, %v269_v46  ;;  %v228_v58 = vld [vmem:[%s633_s9] sm:$0xf]  ;;  %v233_v61 = vmul.f32 %v229_v59, %v229_v59  ;;  %vm277_vm3 = vcmask 58368   ;;  %v138_v19 = vand.u32 127, %v88_v3 }
   0xe   :  { %92 = vperm.xlu2 %434, %v87_v22   ;;  %v186_v52 = vmul.f32 %v184_v47, %v178_v44  ;;  %v189_v57 = vsub.f32 %v187_v53, %v181_v55  ;;  %v232_v60 = vmul.f32 %v228_v58, %v228_v58  ;;  %v267_v9 = vld [vmem:[%s627_s3] sm:$0x3]  ;;  %vm142_vm4 = vcmask 130112   ;;  %s466_s3 = smov [#allocation3]  }
   0xf   :  { %440 = vlog2.f32 %v270_v49  ;;  %v235_v1 = vsel %vm198_vm2, %v233_v61, 0.0  ;;  %v273_v12 = vld [vmem:[%s629_s5] sm:$0x3]  ;;  %v140_v20 = vadd.s32 4294967288, %v138_v19  ;;  %vm147_vm5 = vcmask 1041409  }
  0x10   :  { %83 = vadd.xlane.f32.xlu1 %v82_v23  ;;  %v188_v56 = vsub.f32 %v186_v52, %v180_v54  ;;  %v197_v63 = vmul.f32 %v193_v51, %v189_v57  ;;  %v234_v0 = vsel %vm198_vm2, %v232_v60, 0.0  ;;  %v288_v14 = vsel %vm277_vm3, %v273_v12, 0.0 }
  0x11   :  { %77 = vadd.xlane.f32.xlu0 %v76_v24  ;;  %v236_v5 = vadd.f32 %v235_v1, %v234_v0 }
  0x12   :  { %v196_v62 = vmul.f32 %v192_v50, %v188_v56  ;;  %v200_v4 = vsel %vm198_vm2, %v197_v63, 0.0 }
  0x14   :  { %v199_v2 = vsel %vm198_vm2, %v196_v62, 0.0 }
  0x15   :  { %v441_v6 = vpop.eup %440  ;;  %v201_v7 = vadd.f32 %v200_v4, %v199_v2 }
  0x16   :  { %435 = vset.pattern.permute.xlu2 %v96_v16  ;;  %v272_v8 = vmul.f32 0.6931472, %v441_v6 }
  0x18   :  { %v274_v10 = vsub.f32 %v267_v9, %v272_v8 }
  0x1a   :  { %v275_v11 = vmul.f32 %v274_v10, %v274_v10 }
  0x1c   :  { %v276_v13 = vmul.f32 %v275_v11, %v273_v12 }
  0x1e   :  { %98 = vperm.xlu2 %435, %v87_v22   ;;  %v278_v15 = vsel %vm277_vm3, %v276_v13, 0.0 }
  0x25   :  { %105 = vperm.xlu0 %436, %v100_v25  }
  0x26   :  { %438 = vset.pattern.permute.xlu2 %v464_v26 }
  0x29   :  { %111 = vperm.xlu1 %437, %v100_v25  }
  0x2d   :  { %439 = vset.pattern.permute.xlu0 %v464_v26 }
  0x4f   :  { %202 = vadd.xlane.f32.xlu0 %v201_v7 }
  0x53   :  { %216 = vadd.xlane.f32.xlu1 %v215_v40 }
  0x57   :  { %289 = vadd.xlane.f32.xlu0 %v288_v14 }
  0x68   :  { %v93_v27 = vpop.permute.xlu2 %92 }
  0x78   :  { %v99_v34 = vpop.permute.xlu2 %98 }
  0x7b   :  { %v81_v31 = vpop.xlane.xlu1 %80 }
  0x7c   :  { %v75_v28 = vpop.xlane.xlu0 %74 }
  0x7d   :  { %v117_v29 = vmul.f32 %v93_v27, %v75_v28 }
  0x7f   :  { %126 = vperm.xlu2 %438, %v117_v29  }
  0x83   :  { %v84_v35 = vpop.xlane.xlu1 %83 }
  0x84   :  { %v78_v30 = vpop.xlane.xlu0 %77 }
  0x85   :  { %v118_v36 = vmul.f32 %v99_v34, %v78_v30  ;;  %v230_v30 = vld [vmem:[%s634_s10] sm:$0x3] }
  0x86   :  { %v251_v3 = vsel %vm150_vm1, %v230_v30, 0.0 }
  0x97   :  { %v106_v32 = vpop.permute.xlu0 %105 }
  0x98   :  { %v119_v33 = vmul.f32 %v106_v32, %v81_v31 }
  0x9a   :  { %132 = vperm.xlu2 %438, %v119_v33  }
  0x9b   :  { %v112_v37 = vpop.permute.xlu1 %111 }
  0x9c   :  { %v120_v38 = vmul.f32 %v112_v37, %v84_v35 }
  0xa2   :  { %129 = vperm.xlu2 %438, %v118_v36  }
  0xaa   :  { %135 = vperm.xlu2 %438, %v120_v38  }
  0xc2   :  { %v203_v33 = vpop.xlane.xlu0 %202 }
  0xc3   :  { %v204_v36 = vrot.slane %v203_v33, 4 }
  0xc5   :  { %v205_v40 = vadd.f32 %v204_v36, %v203_v33 }
  0xc6   :  { %v217_v34 = vpop.xlane.xlu1 %216 }
  0xc7   :  { %v218_v37 = vrot.slane %v217_v34, 4  ;;  %v206_v48 = vrot.slane %v205_v40, 2 }
  0xc9   :  { %v219_v42 = vadd.f32 %v218_v37, %v217_v34  ;;  %v207_v58 = vadd.f32 %v206_v48, %v205_v40 }
  0xca   :  { %v290_v43 = vpop.xlane.xlu0 %289 }
  0xcb   :  { %v291_v50 = vrot.slane %v290_v43, 4  ;;  %v220_v51 = vrot.slane %v219_v42, 2 }
  0xcd   :  { %v292_v57 = vadd.f32 %v291_v50, %v290_v43  ;;  %v221_v59 = vadd.f32 %v220_v51, %v219_v42 }
  0xcf   :  { %v293_v1 = vrot.slane %v292_v57, 2  ;;  %v222_v6 = vrot.slane %v221_v59, 1 }
  0xd1   :  { %v294_v12 = vadd.f32 %v293_v1, %v292_v57 }
  0xd3   :  { %166 = vadd.xlane.f32.xlu2 %v165_v41 }
  0xd9   :  { %v127_v16 = vpop.permute.xlu2 %126 }
  0xda   :  { %v139_v23 = vperm.slane %v127_v16, %v138_v19 }
  0xdb   :  { %237 = vadd.xlane.f32.xlu2 %v236_v5  ;;  %v208_v5 = vrot.slane %v207_v58, 1 }
  0xdd   :  { %v209_v14 = vadd.f32 %v208_v5, %v207_v58 }
  0xe3   :  { %279 = vadd.xlane.f32.xlu2 %v278_v15  ;;  %v223_v15 = vadd.f32 %v222_v6, %v221_v59 }
  0xf4   :  { %v133_v17 = vpop.permute.xlu2 %132 }
  0xf5   :  { %v144_v24 = vperm.slane %v133_v17, %v138_v19 }
  0xfc   :  { %v130_v18 = vpop.permute.xlu2 %129 }
  0xfd   :  { %v141_v21 = vperm.slane %v130_v18, %v140_v20 }
  0xff   :  { %v143_v26 = vsel %vm142_vm4, %v141_v21, %v139_v23 }
 0x104   :  { %v136_v22 = vpop.permute.xlu2 %135 }
 0x105   :  { %v145_v25 = vperm.slane %v136_v22, %v140_v20  ;;  %v295_v20 = vrot.slane %v294_v12, 1 }
 0x107   :  { %v146_v27 = vsel %vm142_vm4, %v145_v25, %v144_v24  ;;  %v296_v23 = vadd.f32 %v295_v20, %v294_v12 }
 0x108   :  { %v148_v28 = vsel %vm147_vm5, %v146_v27, %v143_v26  ;;  %v465_v26 = vmov 128.0  }
 0x109   :  { %v151_v29 = vsel %vm150_vm1, %v148_v28, 0.0  ;;  %442 = vrcp.f32 %v465_v26 }
 0x10a   :  { %152 = vadd.xlane.f32.xlu1 %v151_v29 }
 0x10f   :  { %v443_v27 = vpop.eup %442 }
 0x110   :  { %vm364_vm15 = vweird.f32 %v443_v27 }
 0x112   :  { %252 = vadd.xlane.f32.xlu1 %v251_v3 }
 0x146   :  { %v167_v31 = vpop.xlane.xlu2 %166 }
 0x147   :  { %v168_v35 = vrot.slane %v167_v31, 4 }
 0x149   :  { %v169_v39 = vadd.f32 %v168_v35, %v167_v31 }
 0x14b   :  { %v170_v45 = vrot.slane %v169_v39, 2 }
 0x14d   :  { %v171_v55 = vadd.f32 %v170_v45, %v169_v39 }
 0x14e   :  { %v238_v32 = vpop.xlane.xlu2 %237 }
 0x14f   :  { %v239_v38 = vrot.slane %v238_v32, 4  ;;  %v172_v0 = vrot.slane %v171_v55, 1 }
 0x151   :  { %v240_v44 = vadd.f32 %v239_v38, %v238_v32  ;;  %v173_v11 = vadd.f32 %v172_v0, %v171_v55  ;;  %v360_v32 = vmul.f32 128.0, %v443_v27 }
 0x153   :  { %v241_v52 = vrot.slane %v240_v44, 2  ;;  %v361_v35 = vsub.f32 1.0, %v360_v32 }
 0x155   :  { %v242_v61 = vadd.f32 %v241_v52, %v240_v44 }
 0x156   :  { %v280_v41 = vpop.xlane.xlu2 %279 }
 0x157   :  { %v281_v47 = vrot.slane %v280_v41, 4  ;;  %v243_v9 = vrot.slane %v242_v61, 1 }
 0x159   :  { %v282_v54 = vadd.f32 %v281_v47, %v280_v41  ;;  %v244_v17 = vadd.f32 %v243_v9, %v242_v61  ;;  %v362_v41 = vmul.f32 %v443_v27, %v361_v35 }
 0x15b   :  { %v283_v62 = vrot.slane %v282_v54, 2 }
 0x15d   :  { %v284_v10 = vadd.f32 %v283_v62, %v282_v54  ;;  %v363_v54 = vadd.f32 %v443_v27, %v362_v41 }
 0x15f   :  { %v285_v18 = vrot.slane %v284_v10, 1 }
 0x161   :  { %v286_v22 = vadd.f32 %v285_v18, %v284_v10 }
 0x17d   :  { %v153_v46 = vpop.xlane.xlu1 %152 }
 0x17e   :  { %v154_v49 = vrot.slane %v153_v46, 4 }
 0x180   :  { %v155_v53 = vadd.f32 %v154_v49, %v153_v46 }
 0x182   :  { %v156_v56 = vrot.slane %v155_v53, 2 }
 0x184   :  { %v157_v60 = vadd.f32 %v156_v56, %v155_v53 }
 0x185   :  { %v253_v63 = vpop.xlane.xlu1 %252 }
 0x186   :  { %v254_v2 = vrot.slane %v253_v63, 4  ;;  %v158_v4 = vrot.slane %v157_v60, 1 }
 0x188   :  { %v255_v7 = vadd.f32 %v254_v2, %v253_v63  ;;  %v159_v8 = vadd.f32 %v158_v4, %v157_v60  ;;  %v365_v63 = vsel %vm364_vm15, %v443_v27, %v363_v54 }
 0x18a   :  { %v256_v13 = vrot.slane %v255_v7, 2  ;;  %407 = vpush %v159_v8 }
 0x18b   :  { %409 = vpush %v173_v11 }
 0x18c   :  { %v257_v16 = vadd.f32 %v256_v13, %v255_v7  ;;  %411 = vpush %v209_v14 }
 0x18d   :  { %413 = vpush %v223_v15 }
 0x18e   :  { %415 = vpush %v244_v17  ;;  %v258_v19 = vrot.slane %v257_v16, 1 }
 0x190   :  { %v259_v21 = vadd.f32 %v258_v19, %v257_v16 }
 0x192   :  { %417 = vpush %v259_v21 }
 0x193   :  { %419 = vpush %v286_v22 }
 0x194   :  { %421 = vpush %v296_v23 }
 0x1bb   :  { %s597_s10 = spop %407 }
 0x1bc   :  { %s410_s28 = spop %409 }
 0x1bd   :  { %s317_s29 = smul.f32 8.0, %s410_s28  ;;  %s412_s30 = spop %411 }
 0x1be   :  { %s414_s12 = spop %413 }
 0x1bf   :  { %v318_v24 = vstv %s317_s29  ;;  %s337_s13 = smul.f32 2.0, %s414_s12  ;;  %v339_v25 = vstv %s414_s12  ;;  %s416_s14 = spop %415 }
 0x1c0   :  { %444 = vrcp.f32 %v318_v24  ;;  %s246_s0 = smul.f32 0.5, %s416_s14  ;;  %vm324_vm6 = vweird.f32 %v318_v24  ;;  %v330_v44 = vand.u32 2147483648, %v318_v24  ;;  %v328_v49 = vand.u32 2147483647, %v318_v24 }
 0x1c1   :  { %446 = vrcp.f32 %v339_v25  ;;  %s599_s15 = ssub.f32 %s412_s30, %s337_s13  ;;  %vm345_vm11 = vweird.f32 %v339_v25  ;;  %v351_v50 = vand.u32 2147483648, %v339_v25  ;;  %v349_v53 = vand.u32 2147483647, %v339_v25 }
 0x1c2   :  { %v331_v58 = vor.u32 1.1754944e-38, %v330_v44  ;;  %vm329_vm1 = vcmp.eq.f32.partialorder %v328_v49, 8.507059e+37 }
 0x1c3   :  { %s418_s1 = spop %417  ;;  %v352_v61 = vor.u32 1.1754944e-38, %v351_v50  ;;  %vm350_vm2 = vcmp.eq.f32.partialorder %v349_v53, 8.507059e+37 }
 0x1c4   :  { %s601_s2 = ssub.f32 %s246_s0, %s418_s1  ;;  %s603_s16 = spop %419 }
 0x1c5   :  { %s422_s17 = spop %421 }
 0x1c6   :  { %v445_v28 = vpop.eup %444  ;;  %v298_v29 = vstv %s422_s17 }
 0x1c7   :  { %v447_v30 = vpop.eup %446  ;;  %v320_v3 = vmul.f32 %v445_v28, %v318_v24  ;;  %448 = vrcp.f32 %v298_v29  ;;  %vm325_vm7 = vweird.f32 %v445_v28  ;;  %v310_v42 = vand.u32 2147483648, %v298_v29 }
 0x1c8   :  { %v341_v31 = vmul.f32 %v447_v30, %v339_v25  ;;  %vm346_vm8 = vweird.f32 %v447_v30  ;;  %v308_v46 = vand.u32 2147483647, %v298_v29  ;;  %vm605_vm10 = vmor %vm324_vm6, %vm325_vm7  ;;  %vm304_vm12 = vweird.f32 %v298_v29 }
 0x1c9   :  { %v321_v33 = vsub.f32 1.0, %v320_v3  ;;  %vm609_vm13 = vmor %vm345_vm11, %vm346_vm8  ;;  %v311_v55 = vor.u32 1.1754944e-38, %v310_v42 }
 0x1ca   :  { %v342_v34 = vsub.f32 1.0, %v341_v31  ;;  %vm309_vm0 = vcmp.eq.f32.partialorder %v308_v46, 8.507059e+37 }
 0x1cb   :  { %v322_v37 = vmul.f32 %v445_v28, %v321_v33 }
 0x1cc   :  { %v343_v39 = vmul.f32 %v447_v30, %v342_v34 }
 0x1cd   :  { %v449_v36 = vpop.eup %448  ;;  %v323_v43 = vadd.f32 %v445_v28, %v322_v37 }
 0x1ce   :  { %v300_v38 = vmul.f32 %v449_v36, %v298_v29  ;;  %vm305_vm9 = vweird.f32 %v449_v36  ;;  %v344_v47 = vadd.f32 %v447_v30, %v343_v39 }
 0x1cf   :  { %vm306_vm14 = vmor %vm304_vm12, %vm305_vm9  ;;  %v327_v56 = vsel %vm605_vm10, %v445_v28, %v323_v43 }
 0x1d0   :  { %v301_v40 = vsub.f32 1.0, %v300_v38  ;;  %v348_v59 = vsel %vm609_vm13, %v447_v30, %v344_v47  ;;  %v332_v62 = vsel %vm329_vm1, %v331_v58, %v327_v56 }
 0x1d1   :  { %v353_v0 = vsel %vm350_vm2, %v352_v61, %v348_v59 }
 0x1d2   :  { %v302_v45 = vmul.f32 %v449_v36, %v301_v40 }
 0x1d4   :  { %v303_v51 = vadd.f32 %v449_v36, %v302_v45 }
 0x1d6   :  { %v307_v57 = vsel %vm306_vm14, %v449_v36, %v303_v51 }
 0x1d7   :  { %v312_v60 = vsel %vm309_vm0, %v311_v55, %v307_v57 }
 0x1d8   :  { %423 = vpush %v312_v60 }
 0x1d9   :  { %425 = vpush %v332_v62 }
 0x1da   :  { %427 = vpush %v353_v0 }
 0x1db   :  { %429 = vpush %v365_v63 }
 0x209   :  { %s424_s18 = spop %423 }
 0x20a   :  { %s314_s19 = smul.f32 %s424_s18, %s603_s16  ;;  %s426_s20 = spop %425 }
 0x20b   :  { %s334_s8 = smul.f32 %s426_s20, %s597_s10  ;;  %s428_s21 = spop %427 }
 0x20c   :  { %381 = sst [smem:[#allocation3 + $0x4]] %s314_s19  ;;  %s355_s4 = smul.f32 %s428_s21, %s599_s15 }
 0x20d   :  { %375 = sst [smem:[#allocation3 + $0x1]] %s334_s8  ;;  %s430_s22 = spop %429 }
 0x20e   :  { %s369_s6 = sadd.f32 %s355_s4, %s334_s8  ;;  %s367_s23 = smul.f32 %s430_s22, %s601_s2 }
 0x20f   :  { %377 = sst [smem:[#allocation3 + $0x2]] %s355_s4 }
 0x210   :  { %s368_s24 = sadd.f32 0.9189385, %s367_s23 }
 0x212   :  { %s370_s9 = sadd.f32 %s369_s6, %s368_s24 }
 0x213   :  { %379 = sst [smem:[#allocation3 + $0x3]] %s368_s24 }
 0x214   :  { %s371_s27 = sadd.f32 %s370_s9, %s314_s19 }
 0x216   :  { %373 = sst [smem:[#allocation3]] %s371_s27 }
 0x217   :  { %390 = dma.smem_to_hbm %s466_s3, 16, %s388_s26, [#allocation4]  }
 0x218   :  { %462 = dma.done.wait [#allocation4], 16  }
 0x219   :  { %463 = vsyncadd [#allocation4], 4294967280 }
 0x21a   :  { %395 = sfence }
 0x21b   :  { %396 = vsyncpa [#allocation4], 1 }

</bundles_post_ra>
